<compile_context>
chip_gen: v5e
topology: v5e:2x2
jax: 0.10.0
libtpu: 0.0.40
codegen_flags: <defaults>
</compile_context>

<pallas_src>
import functools

import jax
import jax.numpy as jnp
from jax.experimental import pallas as pl
from jax.experimental.pallas import tpu as pltpu

HID1 = 128
HID2 = 64
LANE = 128


def _round_up(x, m):
    return (x + m - 1) // m * m


def _policy_kernel(action_range, action_dim,
                   state_ref, w1_ref, b1_ref, w2_ref, b2_ref,
                   wh_ref, bh_ref, out_ref):
    bf16 = jnp.bfloat16

    # hidden1 + relu  (bf16 operands, f32 accumulation & epilogue)
    x = state_ref[...].astype(bf16)                                  # (TB, S)
    h1 = jnp.dot(x, w1_ref[...].astype(bf16),
                 preferred_element_type=jnp.float32)
    h1 = jnp.maximum(h1 + b1_ref[...], 0.0)                          # (TB, 128)

    # hidden2 + relu
    h2 = jnp.dot(h1.astype(bf16), w2_ref[...].astype(bf16),
                 preferred_element_type=jnp.float32)
    h2 = jnp.maximum(h2 + b2_ref[...], 0.0)                          # (TB, 64)

    # Fused heads: one (HID2, 128) matmul covering [mu | sigma | zero-pad].
    y = jnp.dot(h2.astype(bf16), wh_ref[...].astype(bf16),
                preferred_element_type=jnp.float32)
    y = y + bh_ref[...]                                              # (TB, 128)

    # Lane-wise epilogue: lanes [0, A) -> tanh * range, lanes [A, 128) ->
    # softplus + 1e-5 (stable form).  Both transcendentals run on the same
    # vreg; the padded lanes are discarded by the wrapper slice.
    lane = jax.lax.broadcasted_iota(jnp.int32, y.shape, dimension=1)
    mu = jnp.tanh(y) * action_range
    sigma = jnp.maximum(y, 0.0) + jnp.log1p(jnp.exp(-jnp.abs(y))) + 1e-5
    out_ref[...] = jnp.where(lane < action_dim, mu, sigma).astype(out_ref.dtype)


def gaussian_policy_forward(state, params, action_range, *, block_batch=1024):
    """state: (B, state_dim) f32.  Returns (mu, sigma), each (B, action_dim)."""
    w1, b1, w2, b2, wmu, bmu, wsig, bsig = params
    batch, state_dim = state.shape
    action_dim = wmu.shape[1]

    # --- fuse + lane-pad the two heads (cheap one-time plumbing) ------------
    head_width = max(LANE, _round_up(2 * action_dim, LANE))
    w_heads = jnp.concatenate([wmu, wsig], axis=1)                 # (64, 2A)
    b_heads = jnp.concatenate([bmu, bsig], axis=1)                 # (1, 2A)
    pad = head_width - 2 * action_dim
    w_heads = jnp.pad(w_heads, ((0, 0), (0, pad)))                 # (64, 128)
    b_heads = jnp.pad(b_heads, ((0, 0), (0, pad)))                 # (1, 128)

    # --- batch tiling -------------------------------------------------------
    tb = min(block_batch, _round_up(batch, 8))
    padded_batch = _round_up(batch, tb)
    if padded_batch != batch:
        state = jnp.pad(state, ((0, padded_batch - batch), (0, 0)))
    grid = (padded_batch // tb,)

    full = lambda a: pl.BlockSpec(a.shape, lambda i: (0,) * a.ndim)

    kernel = functools.partial(_policy_kernel, float(action_range),
                               int(action_dim))
    out = pl.pallas_call(
        kernel,
        out_shape=jax.ShapeDtypeStruct((padded_batch, head_width), jnp.float32),
        grid=grid,
        in_specs=[pl.BlockSpec((tb, state_dim), lambda i: (i, 0)),
                  full(w1), full(b1), full(w2), full(b2),
                  full(w_heads), full(b_heads)],
        out_specs=pl.BlockSpec((tb, head_width), lambda i: (i, 0)),
        compiler_params=pltpu.CompilerParams(
            dimension_semantics=("parallel",)),
    )(state, w1, b1, w2, b2, w_heads, b_heads)

    mu = out[:batch, :action_dim]
    sigma = out[:batch, action_dim:2 * action_dim]
    return mu, sigma


def init_params(key, state_dim, action_dim):
    """Mimics nn.Linear's U(-1/sqrt(fan_in), 1/sqrt(fan_in)) init.

    Weights are stored (in_features, out_features); biases as (1, out)."""
    def linear(k, fan_in, fan_out):
        kw, kb = jax.random.split(k)
        bound = 1.0 / jnp.sqrt(float(fan_in))
        w = jax.random.uniform(kw, (fan_in, fan_out), jnp.float32, -bound, bound)
        b = jax.random.uniform(kb, (1, fan_out), jnp.float32, -bound, bound)
        return w, b

    k1, k2, k3, k4 = jax.random.split(key, 4)
    w1, b1 = linear(k1, state_dim, HID1)
    w2, b2 = linear(k2, HID1, HID2)
    wmu, bmu = linear(k3, HID2, action_dim)
    wsig, bsig = linear(k4, HID2, action_dim)
    return (w1, b1, w2, b2, wmu, bmu, wsig, bsig)


def _reference_forward(state, params, action_range, matmul_dtype=jnp.bfloat16):
    """Pure-JAX reference (same bf16 matmul operand precision as the kernel)."""
    w1, b1, w2, b2, wmu, bmu, wsig, bsig = params
    dot = lambda a, b: jnp.dot(a.astype(matmul_dtype), b.astype(matmul_dtype),
                               preferred_element_type=jnp.float32)
    h1 = jnp.maximum(dot(state, w1) + b1, 0.0)
    h2 = jnp.maximum(dot(h1, w2) + b2, 0.0)
    mu = jnp.tanh(dot(h2, wmu) + bmu) * action_range
    sigma = jax.nn.softplus(dot(h2, wsig) + bsig) + 1e-5
    return mu, sigma


if __name__ == "__main__":
    batch = 8
    state_dim = 16
    action_dim = 4
    action_range = 2.0

    key = jax.random.PRNGKey(0)
    kp, ks = jax.random.split(key)
    params = init_params(kp, state_dim, action_dim)
    state = jax.random.normal(ks, (batch, state_dim), jnp.float32)

    mu, sigma = gaussian_policy_forward(state, params, action_range)
    jax.block_until_ready((mu, sigma))

    assert mu.shape == (batch, action_dim) and sigma.shape == (batch, action_dim)

    # Tight check against a reference with matched bf16 matmul operands.
    mu_bf, sig_bf = _reference_forward(state, params, action_range,
                                       matmul_dtype=jnp.bfloat16)
    assert jnp.allclose(mu, mu_bf, atol=1e-4, rtol=1e-4)
    assert jnp.allclose(sigma, sig_bf, atol=1e-4, rtol=1e-4)

    # Loose check against the full-f32 PyTorch-equivalent math (bf16 operand
    # drift only).
    mu_f32, sig_f32 = _reference_forward(state, params, action_range,
                                         matmul_dtype=jnp.float32)
    assert jnp.allclose(mu, mu_f32, atol=5e-2, rtol=5e-2)
    assert jnp.allclose(sigma, sig_f32, atol=5e-2, rtol=5e-2)
    assert bool(jnp.all(sigma > 0.0))

    print("KERNEL_OK")
</pallas_src>

<mosaic_0001>
module attributes {stable_mosaic.version = 11 : i64} {
  func.func @_policy_kernel(%arg0: i32, %arg1: memref<8x16xf32, #tpu.memory_space<vmem>>, %arg2: memref<16x128xf32, #tpu.memory_space<vmem>>, %arg3: memref<1x128xf32, #tpu.memory_space<vmem>>, %arg4: memref<128x64xf32, #tpu.memory_space<vmem>>, %arg5: memref<1x64xf32, #tpu.memory_space<vmem>>, %arg6: memref<64x128xf32, #tpu.memory_space<vmem>>, %arg7: memref<1x128xf32, #tpu.memory_space<vmem>>, %arg8: memref<8x128xf32, #tpu.memory_space<vmem>>) attributes {dimension_semantics = [#tpu.dimension_semantics<parallel>], iteration_bounds = array<i64: 1>, scalar_prefetch = 0 : i64, scratch_operands = 0 : i64, tpu.core_type = #tpu.core_type<tc>, window_params = [{transform_indices = @transform_0, window_bounds = array<i64: 8, 16>}, {pipeline_mode = #tpu.pipeline_mode<synchronous>, transform_indices = @transform_1, window_bounds = array<i64: 16, 128>}, {pipeline_mode = #tpu.pipeline_mode<synchronous>, transform_indices = @transform_2, window_bounds = array<i64: 1, 128>}, {pipeline_mode = #tpu.pipeline_mode<synchronous>, transform_indices = @transform_3, window_bounds = array<i64: 128, 64>}, {pipeline_mode = #tpu.pipeline_mode<synchronous>, transform_indices = @transform_4, window_bounds = array<i64: 1, 64>}, {pipeline_mode = #tpu.pipeline_mode<synchronous>, transform_indices = @transform_5, window_bounds = array<i64: 64, 128>}, {pipeline_mode = #tpu.pipeline_mode<synchronous>, transform_indices = @transform_6, window_bounds = array<i64: 1, 128>}, {transform_indices = @transform_7, window_bounds = array<i64: 8, 128>}]} {
    %c0 = arith.constant 0 : index
    %c0_0 = arith.constant 0 : index
    %0 = vector.load %arg1[%c0, %c0_0] : memref<8x16xf32, #tpu.memory_space<vmem>>, vector<8x16xf32>
    %1 = arith.truncf %0 : vector<8x16xf32> to vector<8x16xbf16>
    %c0_1 = arith.constant 0 : index
    %c0_2 = arith.constant 0 : index
    %2 = vector.load %arg2[%c0_1, %c0_2] : memref<16x128xf32, #tpu.memory_space<vmem>>, vector<16x128xf32>
    %3 = arith.truncf %2 : vector<16x128xf32> to vector<16x128xbf16>
    %cst = arith.constant dense<0.000000e+00> : vector<8x128xf32>
    %4 = tpu.matmul %1, %3, %cst {dimension_numbers = #tpu.dot_dimension_numbers<[1], [0], [0], [1], [0, 0, 1, 1], [], []>} : vector<8x16xbf16>, vector<16x128xbf16>, vector<8x128xf32> -> vector<8x128xf32>
    %c0_3 = arith.constant 0 : index
    %c0_4 = arith.constant 0 : index
    %5 = vector.load %arg3[%c0_3, %c0_4] : memref<1x128xf32, #tpu.memory_space<vmem>>, vector<1x128xf32>
    %6 = vector.broadcast %5 : vector<1x128xf32> to vector<8x128xf32>
    %7 = arith.addf %4, %6 : vector<8x128xf32>
    %cst_5 = arith.constant 0.000000e+00 : f32
    %8 = vector.broadcast %cst_5 : f32 to vector<8x128xf32>
    %9 = arith.maximumf %7, %8 : vector<8x128xf32>
    %10 = arith.truncf %9 : vector<8x128xf32> to vector<8x128xbf16>
    %c0_6 = arith.constant 0 : index
    %c0_7 = arith.constant 0 : index
    %11 = vector.load %arg4[%c0_6, %c0_7] : memref<128x64xf32, #tpu.memory_space<vmem>>, vector<128x64xf32>
    %12 = arith.truncf %11 : vector<128x64xf32> to vector<128x64xbf16>
    %cst_8 = arith.constant dense<0.000000e+00> : vector<8x64xf32>
    %13 = tpu.matmul %10, %12, %cst_8 {dimension_numbers = #tpu.dot_dimension_numbers<[1], [0], [0], [1], [0, 0, 1, 1], [], []>} : vector<8x128xbf16>, vector<128x64xbf16>, vector<8x64xf32> -> vector<8x64xf32>
    %c0_9 = arith.constant 0 : index
    %c0_10 = arith.constant 0 : index
    %14 = vector.load %arg5[%c0_9, %c0_10] : memref<1x64xf32, #tpu.memory_space<vmem>>, vector<1x64xf32>
    %15 = vector.broadcast %14 : vector<1x64xf32> to vector<8x64xf32>
    %16 = arith.addf %13, %15 : vector<8x64xf32>
    %cst_11 = arith.constant 0.000000e+00 : f32
    %17 = vector.broadcast %cst_11 : f32 to vector<8x64xf32>
    %18 = arith.maximumf %16, %17 : vector<8x64xf32>
    %19 = arith.truncf %18 : vector<8x64xf32> to vector<8x64xbf16>
    %c0_12 = arith.constant 0 : index
    %c0_13 = arith.constant 0 : index
    %20 = vector.load %arg6[%c0_12, %c0_13] : memref<64x128xf32, #tpu.memory_space<vmem>>, vector<64x128xf32>
    %21 = arith.truncf %20 : vector<64x128xf32> to vector<64x128xbf16>
    %cst_14 = arith.constant dense<0.000000e+00> : vector<8x128xf32>
    %22 = tpu.matmul %19, %21, %cst_14 {dimension_numbers = #tpu.dot_dimension_numbers<[1], [0], [0], [1], [0, 0, 1, 1], [], []>} : vector<8x64xbf16>, vector<64x128xbf16>, vector<8x128xf32> -> vector<8x128xf32>
    %c0_15 = arith.constant 0 : index
    %c0_16 = arith.constant 0 : index
    %23 = vector.load %arg7[%c0_15, %c0_16] : memref<1x128xf32, #tpu.memory_space<vmem>>, vector<1x128xf32>
    %24 = vector.broadcast %23 : vector<1x128xf32> to vector<8x128xf32>
    %25 = arith.addf %22, %24 : vector<8x128xf32>
    %26 = tpu.iota {dimensions = array<i32: 1>} : vector<8x128xi32>
    %27 = math.tanh %25 : vector<8x128xf32>
    %cst_17 = arith.constant 2.000000e+00 : f32
    %28 = vector.broadcast %cst_17 : f32 to vector<8x128xf32>
    %29 = arith.mulf %27, %28 : vector<8x128xf32>
    %cst_18 = arith.constant 0.000000e+00 : f32
    %30 = vector.broadcast %cst_18 : f32 to vector<8x128xf32>
    %31 = arith.maximumf %25, %30 : vector<8x128xf32>
    %32 = math.absf %25 : vector<8x128xf32>
    %cst_19 = arith.constant 0.000000e+00 : f32
    %33 = vector.broadcast %cst_19 : f32 to vector<8x128xf32>
    %34 = arith.subf %33, %32 : vector<8x128xf32>
    %35 = math.exp %34 : vector<8x128xf32>
    %36 = math.log1p %35 : vector<8x128xf32>
    %37 = arith.addf %31, %36 : vector<8x128xf32>
    %cst_20 = arith.constant 9.99999974E-6 : f32
    %38 = vector.broadcast %cst_20 : f32 to vector<8x128xf32>
    %39 = arith.addf %37, %38 : vector<8x128xf32>
    %c4_i32 = arith.constant 4 : i32
    %40 = vector.broadcast %c4_i32 : i32 to vector<8x128xi32>
    %41 = arith.cmpi slt, %26, %40 : vector<8x128xi32>
    %42 = arith.select %41, %29, %39 : vector<8x128xi1>, vector<8x128xf32>
    %c0_21 = arith.constant 0 : index
    %c0_22 = arith.constant 0 : index
    %43 = vector.load %arg8[%c0_21, %c0_22] : memref<8x128xf32, #tpu.memory_space<vmem>>, vector<8x128xf32>
    tpu.vector_store %arg8[%c0_21, %c0_22], %42 {strides = array<i32>} : memref<8x128xf32, #tpu.memory_space<vmem>>, vector<8x128xf32>,
    return
  }
  func.func @transform_0(%arg0: i32) -> (i32, i32) {
    %c0_i32 = arith.constant 0 : i32
    %c0_i32_0 = arith.constant 0 : i32
    return %arg0, %c0_i32 : i32, i32
  }
  func.func @transform_1(%arg0: i32) -> (i32, i32) {
    %c0_i32 = arith.constant 0 : i32
    %c0_i32_0 = arith.constant 0 : i32
    %c0_i32_1 = arith.constant 0 : i32
    return %c0_i32, %c0_i32_0 : i32, i32
  }
  func.func @transform_2(%arg0: i32) -> (i32, i32) {
    %c0_i32 = arith.constant 0 : i32
    %c0_i32_0 = arith.constant 0 : i32
    %c0_i32_1 = arith.constant 0 : i32
    return %c0_i32, %c0_i32_0 : i32, i32
  }
  func.func @transform_3(%arg0: i32) -> (i32, i32) {
    %c0_i32 = arith.constant 0 : i32
    %c0_i32_0 = arith.constant 0 : i32
    %c0_i32_1 = arith.constant 0 : i32
    return %c0_i32, %c0_i32_0 : i32, i32
  }
  func.func @transform_4(%arg0: i32) -> (i32, i32) {
    %c0_i32 = arith.constant 0 : i32
    %c0_i32_0 = arith.constant 0 : i32
    %c0_i32_1 = arith.constant 0 : i32
    return %c0_i32, %c0_i32_0 : i32, i32
  }
  func.func @transform_5(%arg0: i32) -> (i32, i32) {
    %c0_i32 = arith.constant 0 : i32
    %c0_i32_0 = arith.constant 0 : i32
    %c0_i32_1 = arith.constant 0 : i32
    return %c0_i32, %c0_i32_0 : i32, i32
  }
  func.func @transform_6(%arg0: i32) -> (i32, i32) {
    %c0_i32 = arith.constant 0 : i32
    %c0_i32_0 = arith.constant 0 : i32
    %c0_i32_1 = arith.constant 0 : i32
    return %c0_i32, %c0_i32_0 : i32, i32
  }
  func.func @transform_7(%arg0: i32) -> (i32, i32) {
    %c0_i32 = arith.constant 0 : i32
    %c0_i32_0 = arith.constant 0 : i32
    return %arg0, %c0_i32 : i32, i32
  }
}

</mosaic_0001>

<bundles_post_ra>
// kernel: tpu_custom_call.1
= control target key start
LH: loop header
LB: loop body
LE: loop exit
PB: predicated region body
PF: predicated region fallthrough
CT: control target
= control target key end

     0   :  { %vm37_vm0 = vcmask 130048   ;;  %s343_s0 = inlined_call_operand.vmem [shape: f32[8,16], index: 0, kind: input, shape index: {}]   ;;  %s344_s1 = inlined_call_operand.vmem [shape: f32[16,128], index: 1, kind: input, shape index: {}]   ;;  %s345_s2 = inlined_call_operand.vmem [shape: f32[1,128], index: 2, kind: input, shape index: {}]   ;;  %s346_s3 = inlined_call_operand.vmem [shape: f32[128,64], index: 3, kind: input, shape index: {}]   ;;  %s347_s4 = inlined_call_operand.vmem [shape: f32[1,64], index: 4, kind: input, shape index: {}]   ;;  %s348_s5 = inlined_call_operand.vmem [shape: f32[64,128], index: 5, kind: input, shape index: {}]   ;;  %s349_s6 = inlined_call_operand.vmem [shape: f32[1,128], index: 6, kind: input, shape index: {}]   ;;  %s350_s7 = inlined_call_operand.hbm [shape: f32[8,128], index: 7, kind: output, shape index: {}]  }
   0x1   :  { %v30_v0 = vld [vmem:[%s344_s1] sm:$0xff]  ;;  %v31_v1 = vld [vmem:[%s344_s1 + $0x8] sm:$0xff]  ;;  %v70_v4 = vld [vmem:[%s346_s3 + $0x70] sm:$0xff] }
   0x2   :  { %v28_v2 = vld [vmem:[%s343_s0] sm:$0xff]  ;;  %v32_v3 = vpack.c.bf16 %v31_v1, %v30_v0  ;;  %v71_v5 = vld [vmem:[%s346_s3 + $0x78] sm:$0xff]  ;;  %v69_v9 = vld [vmem:[%s346_s3 + $0x68] sm:$0xff] }
   0x3   :  { %v68_v6 = vld [vmem:[%s346_s3 + $0x60] sm:$0xff]  ;;  %v29_v7 = vpack.c.bf16 %v28_v2, %v28_v2  ;;  %v79_v8 = vpack.c.bf16 %v71_v5, %v70_v4  ;;  %v66_v11 = vld [vmem:[%s346_s3 + $0x50] sm:$0xff]  ;;  %v67_v12 = vld [vmem:[%s346_s3 + $0x58] sm:$0xff] }
   0x4   :  { %48 = vmatpush.bf16.msra.mxu0 %v32_v3  ;;  %v78_v10 = vpack.c.bf16 %v69_v9, %v68_v6 }
   0x5   :  { %84 = vmatpush.bf16.msra.mxu1 %v79_v8 }
   0x7   :  { %171 = vmatmul.msk.bf16.vlgmr.msra.gmra.mxu0 %vm37_vm0, %v29_v7 }
   0x8   :  { %12 = vsyncpa [#allocation3], 0  ;;  %v77_v13 = vpack.c.bf16 %v67_v12, %v66_v11  ;;  %v64_v14 = vld [vmem:[%s346_s3 + $0x40] sm:$0xff]  ;;  %v65_v15 = vld [vmem:[%s346_s3 + $0x48] sm:$0xff]  ;;  %vm115_vm1 = vcmask 523264   ;;  %v132_v0 = vlaneseq  ;;  %s162_s10 = sshll.u32 %s350_s7, 4  ;;  %s163_s10 = int_to_ptr.hbm [resolvable:$true] %s162_s10 }
   0x9   :  { %85 = vmatpush.bf16.msra.mxu1 %v78_v10  ;;  %v76_v16 = vpack.c.bf16 %v65_v15, %v64_v14  ;;  %v62_v17 = vld [vmem:[%s346_s3 + $0x30] sm:$0xff]  ;;  %v63_v18 = vld [vmem:[%s346_s3 + $0x38] sm:$0xff]  ;;  %v60_v20 = vld [vmem:[%s346_s3 + $0x20] sm:$0xff] }
   0xa   :  { %v75_v19 = vpack.c.bf16 %v63_v18, %v62_v17  ;;  %v61_v21 = vld [vmem:[%s346_s3 + $0x28] sm:$0xff]  ;;  %v58_v23 = vld [vmem:[%s346_s3 + $0x10] sm:$0xff]  ;;  %v59_v24 = vld [vmem:[%s346_s3 + $0x18] sm:$0xff]  ;;  %v133_v5 = vand.u32 127, %v132_v0 }
   0xb   :  { %v74_v22 = vpack.c.bf16 %v61_v21, %v60_v20  ;;  %v73_v25 = vpack.c.bf16 %v59_v24, %v58_v23  ;;  %v56_v26 = vld [vmem:[%s346_s3] sm:$0xff]  ;;  %v57_v27 = vld [vmem:[%s346_s3 + $0x8] sm:$0xff]  ;;  %v105_v29 = vld [vmem:[%s348_s5 + $0x30] sm:$0xff] }
   0xc   :  { %v72_v28 = vpack.c.bf16 %v57_v27, %v56_v26  ;;  %v106_v30 = vld [vmem:[%s348_s5 + $0x38] sm:$0xff]  ;;  %v103_v31 = vld [vmem:[%s348_s5 + $0x20] sm:$0xff]  ;;  %v104_v33 = vld [vmem:[%s348_s5 + $0x28] sm:$0xff]  ;;  %vm152_vm3 = vcmp.lt.s32.totalorder %v133_v5, 4 }
   0xd   :  { %86 = vmatpush.bf16.msra.mxu1 %v77_v13  ;;  %v110_v32 = vpack.c.bf16 %v106_v30, %v105_v29  ;;  %v109_v34 = vpack.c.bf16 %v104_v33, %v103_v31  ;;  %v174_v35 = vld [vmem:[%s345_s2] ss:$0 sm:$0xff]  ;;  %v101_v41 = vld [vmem:[%s348_s5 + $0x10] sm:$0xff]  ;;  %v102_v42 = vld [vmem:[%s348_s5 + $0x18] sm:$0xff] }
   0xe   :  { %v108_v43 = vpack.c.bf16 %v102_v42, %v101_v41  ;;  %v99_v44 = vld [vmem:[%s348_s5] sm:$0xff]  ;;  %v100_v45 = vld [vmem:[%s348_s5 + $0x8] sm:$0xff] }
   0xf   :  { %123 = vmatpush.bf16.msra.mxu2 %v110_v32  ;;  %v107_v46 = vpack.c.bf16 %v100_v45, %v99_v44  ;;  %v175_v47 = vld [vmem:[%s347_s4] ss:$0 sm:$0xff]  ;;  %s209_s4 = smov [#allocation2]  }
  0x10   :  { %v176_v53 = vld [vmem:[%s349_s6] ss:$0 sm:$0xff]  ;;  %s160_s5 = sshll.u32 %s209_s4, 4  ;;  %s161_s5 = int_to_ptr.vmem [resolvable:$true] %s160_s5 }
  0x11   :  { %87 = vmatpush.bf16.msra.mxu1 %v76_v16 }
  0x13   :  { %124 = vmatpush.bf16.msra.mxu2 %v109_v34 }
  0x15   :  { %88 = vmatpush.bf16.msra.mxu1 %v75_v19 }
  0x17   :  { %125 = vmatpush.bf16.msra.mxu2 %v108_v43 }
  0x19   :  { %89 = vmatpush.bf16.msra.mxu1 %v74_v22 }
  0x1b   :  { %126 = vmatpush.bf16.msra.mxu2 %v107_v46 }
  0x1d   :  { %90 = vmatpush.bf16.msra.mxu1 %v73_v25 }
  0x21   :  { %91 = vmatpush.bf16.msra.mxu1 %v72_v28 }
  0x84   :  { %v50_v36 = vpop.f32.mrf.mxu0 }
  0x85   :  { %v51_v37 = vadd.f32 %v174_v35, %v50_v36 }
  0x87   :  { %v54_v38 = vmax.f32 %v51_v37, 0.0 }
  0x89   :  { %v55_v39 = vpack.c.bf16 %v54_v38, %v54_v38 }
  0x8b   :  { %92 = vmatmul.bf16.vlgmr.msra.gmra.mxu1 %v55_v39 }
  0x8c   :  { %v52_v40 = vpop.f32.mrf.mxu0 }
 0x108   :  { %v93_v48 = vpop.f32.mrf.mxu1 }
 0x109   :  { %v94_v49 = vadd.f32 %v175_v47, %v93_v48 }
 0x10b   :  { %v97_v50 = vmax.f32 %v94_v49, 0.0 }
 0x10d   :  { %v98_v51 = vpack.c.bf16 %v97_v50, %v97_v50 }
 0x10f   :  { %172 = vmatmul.msk.bf16.vlgmr.msra.gmra.mxu2 %vm115_vm1, %v98_v51 }
 0x110   :  { %v95_v52 = vpop.f32.mrf.mxu1 }
 0x192   :  { %v128_v54 = vpop.f32.mrf.mxu2 }
 0x193   :  { %v129_v55 = vadd.f32 %v176_v53, %v128_v54 }
 0x195   :  { %v137_v56 = vand.u32 2147483647, %v129_v55  ;;  %v136_v6 = vmax.f32 %v129_v55, 0.0 }
 0x197   :  { %v138_v57 = vsub.f32 0.0, %v137_v56 }
 0x199   :  { %v139_v58 = vmul.f32 1.442695, %v138_v57 }
 0x19a   :  { %v130_v59 = vpop.f32.mrf.mxu2 }
 0x19b   :  { %177 = vpow2.f32 %v139_v58 }
 0x1a1   :  { %v178_v60 = vpop.eup %177 }
 0x1a2   :  { %v141_v61 = vadd.f32 1.0, %v178_v60  ;;  %v144_v62 = vmul.f32 -0.5, %v178_v60  ;;  %v147_v1 = vand.u32 2147483647, %v178_v60 }
 0x1a4   :  { %179 = vlog2.f32 %v141_v61  ;;  %v145_v63 = vadd.f32 1.0, %v144_v62  ;;  %vm148_vm2 = vcmp.lt.f32.partialorder %v147_v1, 0.0004427343 }
 0x1a5   :  { %181 = vtanh.f32 %v129_v55 }
 0x1a6   :  { %v146_v4 = vmul.f32 %v178_v60, %v145_v63 }
 0x1aa   :  { %v180_v2 = vpop.eup %179 }
 0x1ab   :  { %v143_v3 = vmul.f32 0.6931472, %v180_v2  ;;  %v182_v7 = vpop.eup %181 }
 0x1ac   :  { %v135_v10 = vmul.f32 2.0, %v182_v7 }
 0x1ad   :  { %v149_v8 = vsel %vm148_vm2, %v146_v4, %v143_v3 }
 0x1ae   :  { %v150_v9 = vadd.f32 %v149_v8, %v136_v6 }
 0x1b0   :  { %v151_v11 = vadd.f32 1e-05, %v150_v9 }
 0x1b2   :  { %v153_v12 = vsel %vm152_vm3, %v135_v10, %v151_v11 }
 0x1b3   :  { %154 = vst [vmem:[#allocation2] sm:$0xff] %v153_v12 }
 0x1b4   :  { %165 = dma.vmem_to_hbm [thread:$0]  %s161_s5, 128, %s163_s10, [#allocation3]  }
 0x1b5   :  { %207 = dma.done.wait [#allocation3], 128  }
 0x1b6   :  { %208 = vsyncadd [#allocation3], 4294967168 }
 0x1b7   :  { %170 = vsyncpa [#allocation3], 1 }

</bundles_post_ra>
